<compile_context>
chip_gen: v7x
topology: tpu7x:2x2x1
jax: 0.10.0
libtpu: 0.0.40
codegen_flags: <defaults>
</compile_context>

<pallas_src>
import jax
import jax.numpy as jnp
from jax.experimental import pallas as pl
from jax.experimental.pallas import tpu as pltpu

# Packed-parameter column indices (last dim of the (T, 8) parameter block).
_MU, _NIS, _INVA, _B, _C, _ISBELL, _VALID = range(7)


def _fuzzy_var_kernel(x_ref, p_ref, out_ref):
    x = x_ref[...]                          # (1, BB)   batch on lanes
    p = p_ref[...]                          # (T, 8)    packed per-MF params

    mu      = p[:, _MU:_MU + 1]             # (T, 1)
    nis     = p[:, _NIS:_NIS + 1]           # (T, 1)  = -1 / (2 * sigma^2)
    inv_a   = p[:, _INVA:_INVA + 1]         # (T, 1)  = 1 / a
    b       = p[:, _B:_B + 1]               # (T, 1)
    c       = p[:, _C:_C + 1]               # (T, 1)
    is_bell = p[:, _ISBELL:_ISBELL + 1] > 0.5   # (T, 1) bool
    valid   = p[:, _VALID:_VALID + 1]       # (T, 1)  1.0 real MF / 0.0 padding

    # Gaussian log-membership via multiplies only (exp underflow -> 0 = ref).
    diff = x - mu                           # (T, BB)
    gauss_arg = diff * diff * nis

    # Bell: dist = ((x - c)/a)^2 ; dist^b = exp(b * log(dist)) (b > 0).
    z = (x - c) * inv_a
    dist = z * z
    bell_arg = b * jnp.log(jnp.maximum(dist, 1e-30))
    # Clamp so exp() stays finite: ref would give ~0 there anyway, and it keeps
    # the approx-reciprocal + Newton path NaN-free.
    bell_arg = jnp.minimum(bell_arg, 85.0)

    # Single shared exp() per element (EUP is the binding compute slot).
    e = jnp.exp(jnp.where(is_bell, bell_arg, gauss_arg))

    # Bell denominator reciprocal on the EUP (approx) + one Newton refinement
    # (2 VPU ops) -> ~1e-7 relative error, well inside the 1e-5 tolerance.
    d = 1.0 + e
    r = pl.reciprocal(d, approx=True)
    r = r * (2.0 - d * r)

    y = jnp.where(is_bell, r, e)
    out_ref[...] = (y * valid).astype(out_ref.dtype)


def _round_up(n, m):
    return pl.cdiv(n, m) * m


def _num_tensorcores():
    # Best-effort query; defaults to 1 (which keeps behaviour identical to the
    # single-TC chips) if the attribute is unavailable.
    try:
        d = jax.devices()[0]
        return max(1, int(getattr(d, "num_cores", 1) or 1))
    except Exception:
        return 1


def fuzzy_var_forward(x, mu, sigma, a, b, c, is_bell, valid, *,
                      block_b=None, layout="BT"):
    """ANFIS fuzzification layer.

    Args:
      x: (B, 1) or (B,) float32 input variable.
      mu, sigma, a, b, c, is_bell, valid: (T,) float32 per-output-column
        membership-function parameters / masks (T = num_mfs + padding).
      block_b: optional lane-tile override (rounded down to a 128 multiple).
      layout: "BT" -> (B, T) module-convention output (one extra transpose);
              "TB" -> lane-dense (T, B) output, no transpose (preferred when
              the consumer can take it, e.g. the ANFIS rule layer).
    Returns:
      (B, T) or (T, B) float32 membership values (zeros in padding columns).
    """
    x = jnp.asarray(x, jnp.float32).reshape(-1)
    B = int(x.shape[0])
    T = int(mu.shape[0])

    # Host/XLA-side precompute: no per-element divides inside the kernel.
    mu = jnp.asarray(mu, jnp.float32)
    sigma = jnp.asarray(sigma, jnp.float32)
    a = jnp.asarray(a, jnp.float32)
    b = jnp.asarray(b, jnp.float32)
    c = jnp.asarray(c, jnp.float32)
    is_bell = jnp.asarray(is_bell, jnp.float32)
    valid = jnp.asarray(valid, jnp.float32)
    neg_inv_2sig2 = (-0.5) / (sigma * sigma)
    inv_a = 1.0 / a

    # One packed (T, 8) parameter block -> a single constant-index BlockSpec.
    params = jnp.stack(
        [mu, neg_inv_2sig2, inv_a, b, c, is_bell, valid,
         jnp.zeros((T,), jnp.float32)], axis=1)            # (T, 8)

    # --- Lane tile for the batch axis (multiple of 128). -------------------
    if block_b is not None:
        BB = max(128, (int(block_b) // 128) * 128)
    else:
        # Big tiles amortise per-grid-step overhead; footprint at BB=32768 is
        # only ~2.4 MiB double-buffered, far under every chip's VMEM budget.
        BB = int(min(_round_up(B, 128), 32768))
        # v7x: make sure the "parallel" batch axis has >= 2 steps so both
        # TensorCores get work (no-op where there is a single TC).
        if _num_tensorcores() > 1 and _round_up(B, 128) // BB < 2 and B > 128:
            BB = max(128, int(_round_up(pl.cdiv(B, 2), 128)))

    B_pad = int(_round_up(B, BB))
    x_row = jnp.zeros((1, B_pad), jnp.float32).at[0, :B].set(x)
    grid = (B_pad // BB,)

    # Explicit VMEM budget (double-buffered x + out tiles + the tiny param
    # block, with ~2x headroom), clamped to stay valid on v7x's 32 MiB scope.
    tile_bytes = 4 * (BB + T * BB + T * 8)
    vmem_limit = int(min(32 * 1024 * 1024, max(4 * 1024 * 1024, 4 * tile_bytes)))

    cost = pl.CostEstimate(
        flops=12 * B_pad * T,
        transcendentals=3 * B_pad * T,                  # log + exp + rcp
        bytes_accessed=4 * (B_pad + B_pad * T + 8 * T))

    out_tb = pl.pallas_call(
        _fuzzy_var_kernel,
        out_shape=jax.ShapeDtypeStruct((T, B_pad), jnp.float32),
        grid=grid,
        in_specs=[pl.BlockSpec((1, BB), lambda i: (0, i)),
                  pl.BlockSpec((T, 8), lambda i: (0, 0))],
        out_specs=pl.BlockSpec((T, BB), lambda i: (0, i)),
        compiler_params=pltpu.CompilerParams(
            dimension_semantics=("parallel",),   # megacore-shards batch (v7x)
            vmem_limit_bytes=vmem_limit),
        cost_estimate=cost,
    )(x_row, params)

    if layout == "TB":
        return out_tb[:, :B]          # lane-dense, no transpose round-trip
    # Module-convention (B, T) layout: one XLA transpose (layout plumbing).
    return out_tb[:, :B].T


def _reference(x_col, mu, sigma, a, b, c, is_bell, valid):
    gauss = jnp.exp(-((x_col - mu) ** 2) / (2.0 * sigma * sigma))
    dist = ((x_col - c) / a) ** 2
    bell = 1.0 / (1.0 + jnp.power(dist, b))
    y = jnp.where(is_bell > 0.5, bell, gauss)
    return y * valid


if __name__ == "__main__":
    # Module configuration (deterministic, in-script):
    #   mfdefs = [Gauss(-1.0, 0.5), Gauss(0.0, 1.0), Gauss(1.0, 1.5),
    #             Bell(a=1.0, b=2.0, c=0.5), Bell(a=2.0, b=3.0, c=-0.5)]
    #   pad_to(8)  -> padding = 3, output width T = 8.
    num_mfs = 5
    total = 8
    batch = 300   # exercises batch padding and (with block_b=128) a 3-step grid

    def pad_row(vals, fill):
        vals = list(vals) + [fill] * (total - len(vals))
        return jnp.asarray(vals, jnp.float32)

    mu      = pad_row([-1.0, 0.0, 1.0, 0.0, 0.0], 0.0)
    sigma   = pad_row([0.5, 1.0, 1.5, 1.0, 1.0], 1.0)  # pad 1.0: finite inverses
    a       = pad_row([1.0, 1.0, 1.0, 1.0, 2.0], 1.0)
    b       = pad_row([1.0, 1.0, 1.0, 2.0, 3.0], 1.0)
    c       = pad_row([0.0, 0.0, 0.0, 0.5, -0.5], 0.0)
    is_bell = pad_row([0.0, 0.0, 0.0, 1.0, 1.0], 0.0)
    valid   = pad_row([1.0] * num_mfs, 0.0)

    key = jax.random.PRNGKey(0)
    x = jax.random.normal(key, (batch, 1), dtype=jnp.float32)
    ref = _reference(x, mu, sigma, a, b, c, is_bell, valid)

    # 1) Default (auto tile) path, module-convention (B, T) output.
    out_bt = fuzzy_var_forward(x, mu, sigma, a, b, c, is_bell, valid)
    out_bt = jax.block_until_ready(out_bt)
    assert out_bt.shape == (batch, total), out_bt.shape
    assert jnp.allclose(out_bt, ref, atol=1e-5, rtol=1e-5), (
        "BT mismatch, max abs err = "
        f"{float(jnp.max(jnp.abs(out_bt - ref)))}")

    # 2) Small forced tile (multi-step grid / pipelining) with the lane-dense
    #    (T, B) fast-path output.
    out_tb = fuzzy_var_forward(x, mu, sigma, a, b, c, is_bell, valid,
                               block_b=128, layout="TB")
    out_tb = jax.block_until_ready(out_tb)
    assert out_tb.shape == (total, batch), out_tb.shape
    assert jnp.allclose(out_tb, ref.T, atol=1e-5, rtol=1e-5), (
        "TB mismatch, max abs err = "
        f"{float(jnp.max(jnp.abs(out_tb - ref.T)))}")

    print("KERNEL_OK")
</pallas_src>

<mosaic_0001>
module attributes {stable_mosaic.version = 11 : i64} {
  func.func @_fuzzy_var_kernel(%arg0: i32, %arg1: memref<1x384xf32, #tpu.memory_space<vmem>>, %arg2: memref<8x8xf32, #tpu.memory_space<vmem>>, %arg3: memref<8x384xf32, #tpu.memory_space<vmem>>) attributes {dimension_semantics = [#tpu.dimension_semantics<parallel>], iteration_bounds = array<i64: 1>, scalar_prefetch = 0 : i64, scratch_operands = 0 : i64, tpu.core_type = #tpu.core_type<tc>, window_params = [{transform_indices = @transform_0, window_bounds = array<i64: 1, 384>}, {pipeline_mode = #tpu.pipeline_mode<synchronous>, transform_indices = @transform_1, window_bounds = array<i64: 8, 8>}, {transform_indices = @transform_2, window_bounds = array<i64: 8, 384>}]} {
    %c0 = arith.constant 0 : index
    %c0_0 = arith.constant 0 : index
    %0 = vector.load %arg1[%c0, %c0_0] : memref<1x384xf32, #tpu.memory_space<vmem>>, vector<1x384xf32>
    %c0_1 = arith.constant 0 : index
    %c0_2 = arith.constant 0 : index
    %1 = vector.load %arg2[%c0_1, %c0_2] : memref<8x8xf32, #tpu.memory_space<vmem>>, vector<8x8xf32>
    %2 = vector.extract_strided_slice %1 {offsets = [0, 0], sizes = [8, 1], strides = [1, 1]} : vector<8x8xf32> to vector<8x1xf32>
    %3 = vector.extract_strided_slice %1 {offsets = [0, 1], sizes = [8, 1], strides = [1, 1]} : vector<8x8xf32> to vector<8x1xf32>
    %4 = vector.extract_strided_slice %1 {offsets = [0, 2], sizes = [8, 1], strides = [1, 1]} : vector<8x8xf32> to vector<8x1xf32>
    %5 = vector.extract_strided_slice %1 {offsets = [0, 3], sizes = [8, 1], strides = [1, 1]} : vector<8x8xf32> to vector<8x1xf32>
    %6 = vector.extract_strided_slice %1 {offsets = [0, 4], sizes = [8, 1], strides = [1, 1]} : vector<8x8xf32> to vector<8x1xf32>
    %7 = vector.extract_strided_slice %1 {offsets = [0, 5], sizes = [8, 1], strides = [1, 1]} : vector<8x8xf32> to vector<8x1xf32>
    %cst = arith.constant 5.000000e-01 : f32
    %8 = vector.broadcast %cst : f32 to vector<8x1xf32>
    %9 = arith.cmpf ogt, %7, %8 : vector<8x1xf32>
    %10 = vector.extract_strided_slice %1 {offsets = [0, 6], sizes = [8, 1], strides = [1, 1]} : vector<8x8xf32> to vector<8x1xf32>
    %11 = vector.broadcast %0 : vector<1x384xf32> to vector<8x384xf32>
    %12 = vector.broadcast %2 : vector<8x1xf32> to vector<8x384xf32>
    %13 = arith.subf %11, %12 : vector<8x384xf32>
    %14 = arith.mulf %13, %13 : vector<8x384xf32>
    %15 = vector.broadcast %3 : vector<8x1xf32> to vector<8x384xf32>
    %16 = arith.mulf %14, %15 : vector<8x384xf32>
    %17 = vector.broadcast %0 : vector<1x384xf32> to vector<8x384xf32>
    %18 = vector.broadcast %6 : vector<8x1xf32> to vector<8x384xf32>
    %19 = arith.subf %17, %18 : vector<8x384xf32>
    %20 = vector.broadcast %4 : vector<8x1xf32> to vector<8x384xf32>
    %21 = arith.mulf %19, %20 : vector<8x384xf32>
    %22 = arith.mulf %21, %21 : vector<8x384xf32>
    %cst_3 = arith.constant 1.000000e-30 : f32
    %23 = vector.broadcast %cst_3 : f32 to vector<8x384xf32>
    %24 = arith.maximumf %22, %23 : vector<8x384xf32>
    %25 = math.log %24 : vector<8x384xf32>
    %26 = vector.broadcast %5 : vector<8x1xf32> to vector<8x384xf32>
    %27 = arith.mulf %26, %25 : vector<8x384xf32>
    %cst_4 = arith.constant 8.500000e+01 : f32
    %28 = vector.broadcast %cst_4 : f32 to vector<8x384xf32>
    %29 = arith.minimumf %27, %28 : vector<8x384xf32>
    %30 = vector.shape_cast %9 : vector<8x1xi1> to vector<8x1xi1>
    %31 = vector.broadcast %30 : vector<8x1xi1> to vector<8x384xi1>
    %32 = arith.select %31, %29, %16 : vector<8x384xi1>, vector<8x384xf32>
    %33 = math.exp %32 : vector<8x384xf32>
    %cst_5 = arith.constant 1.000000e+00 : f32
    %34 = vector.broadcast %cst_5 : f32 to vector<8x384xf32>
    %35 = arith.addf %34, %33 : vector<8x384xf32>
    %36 = tpu.reciprocal %35 {approx = true} : vector<8x384xf32> -> vector<8x384xf32>
    %37 = arith.mulf %35, %36 : vector<8x384xf32>
    %cst_6 = arith.constant 2.000000e+00 : f32
    %38 = vector.broadcast %cst_6 : f32 to vector<8x384xf32>
    %39 = arith.subf %38, %37 : vector<8x384xf32>
    %40 = arith.mulf %36, %39 : vector<8x384xf32>
    %41 = vector.shape_cast %9 : vector<8x1xi1> to vector<8x1xi1>
    %42 = vector.broadcast %41 : vector<8x1xi1> to vector<8x384xi1>
    %43 = arith.select %42, %40, %33 : vector<8x384xi1>, vector<8x384xf32>
    %44 = vector.broadcast %10 : vector<8x1xf32> to vector<8x384xf32>
    %45 = arith.mulf %43, %44 : vector<8x384xf32>
    %c0_7 = arith.constant 0 : index
    %c0_8 = arith.constant 0 : index
    %46 = vector.load %arg3[%c0_7, %c0_8] : memref<8x384xf32, #tpu.memory_space<vmem>>, vector<8x384xf32>
    tpu.vector_store %arg3[%c0_7, %c0_8], %45 {strides = array<i32>} : memref<8x384xf32, #tpu.memory_space<vmem>>, vector<8x384xf32>,
    return
  }
  func.func @transform_0(%arg0: i32) -> (i32, i32) {
    %c0_i32 = arith.constant 0 : i32
    %c0_i32_0 = arith.constant 0 : i32
    return %c0_i32, %arg0 : i32, i32
  }
  func.func @transform_1(%arg0: i32) -> (i32, i32) {
    %c0_i32 = arith.constant 0 : i32
    %c0_i32_0 = arith.constant 0 : i32
    %c0_i32_1 = arith.constant 0 : i32
    return %c0_i32, %c0_i32_0 : i32, i32
  }
  func.func @transform_2(%arg0: i32) -> (i32, i32) {
    %c0_i32 = arith.constant 0 : i32
    %c0_i32_0 = arith.constant 0 : i32
    return %c0_i32, %arg0 : i32, i32
  }
}

</mosaic_0001>

<bundles_post_ra>
// kernel: tpu_custom_call.1
= control target key start
LH: loop header
LB: loop body
LE: loop exit
PB: predicated region body
PF: predicated region fallthrough
CT: control target
= control target key end

     0   :  { %7 = vsyncpa [#allocation3], 0  ;;  %s342_s0 = inlined_call_operand.hbm [shape: f32[1,384], index: 0, kind: input, shape index: {}]   ;;  %s343_s1 = inlined_call_operand.hbm [shape: f32[8,8], index: 1, kind: input, shape index: {}]   ;;  %s344_s2 = inlined_call_operand.hbm [shape: f32[8,384], index: 2, kind: output, shape index: {}]  }
   0x1   :  { %8 = vsyncpa [#allocation6], 0 }
   0x2   :  { %9 = vsyncpa [#allocation4], 0  ;;  %s275_s9 = smov [#allocation2]   ;;  %s276_s11 = smov [#allocation5]  }
   0x3   :  { %s16_s10 = sshll.u32 %s275_s9, 4  ;;  %s26_s12 = sshll.u32 %s276_s11, 4  ;;  %s17_s10 = int_to_ptr.vmem [resolvable:$true] %s16_s10  ;;  %s27_s12 = int_to_ptr.vmem [resolvable:$true] %s26_s12 }
   0x4   :  { %s203_s15 = scalar_lea.hbm %s342_s0, 48 }
   0x5   :  { %p204_p0 = scmp.ne.s32.totalorder %s342_s0, %s203_s15  ;;  %p207_p1 = scmp.lt.u32.totalorder %s203_s15, %s342_s0 }
   0x7   :  { %p209_p2 = pnand %p207_p1, %p204_p0 }
   0x9   :  { %212 = shalt.err (!%p209_p2)
}
   0xa   :  { %s213_s20 = scalar_lea.vmem %s17_s10, 48  ;;  %s217_s21 = scalar_lea.vmem %s17_s10, 64 }
   0xb   :  { %p214_p3 = scmp.ne.s32.totalorder %s17_s10, %s213_s20  ;;  %p218_p4 = scmp.lt.s32.totalorder %s17_s10, %s17_s10 }
   0xc   :  { %p219_p5 = scmp.lt.s32.totalorder %s217_s21, %s213_s20 }
   0xe   :  { %p220_p6 = por %p219_p5, %p218_p4 }
  0x10   :  { %p221_p7 = pnand %p220_p6, %p214_p3 }
  0x12   :  { %224 = shalt.err (!%p221_p7)
}
  0x13   :  { %19 = dma.hbm_to_vmem [thread:$0]  %s342_s0, 48, %s17_s10, [#allocation3]  }
  0x14   :  { %s225_s26 = scalar_lea.hbm %s343_s1, 128 }
  0x15   :  { %p226_p8 = scmp.ne.s32.totalorder %s343_s1, %s225_s26  ;;  %p229_p9 = scmp.lt.u32.totalorder %s225_s26, %s343_s1 }
  0x17   :  { %p231_p10 = pnand %p229_p9, %p226_p8 }
  0x19   :  { %234 = shalt.err (!%p231_p10)
}
  0x1a   :  { %s235_s3 = scalar_lea.vmem %s27_s12, 128  ;;  %p240_p12 = scmp.lt.s32.totalorder %s27_s12, %s27_s12 }
  0x1b   :  { %p236_p11 = scmp.ne.s32.totalorder %s27_s12, %s235_s3  ;;  %p241_p13 = scmp.lt.s32.totalorder %s235_s3, %s235_s3 }
  0x1d   :  { %p242_p0 = por %p241_p13, %p240_p12 }
  0x1f   :  { %p243_p1 = pnand %p242_p0, %p236_p11 }
  0x21   :  { %246 = shalt.err (!%p243_p1)
}
  0x22   :  { %29 = dma.hbm_to_vmem [thread:$0]  %s343_s1, 128, %s27_s12, [#allocation6]  }
  0x23   :  { %269 = dma.done.wait [#allocation3], 48  }
  0x24   :  { %270 = vsyncadd [#allocation3], 4294967248 }
  0x25   :  { %271 = dma.done.wait [#allocation6], 128  }
  0x26   :  { %272 = vsyncadd [#allocation6], 4294967168  ;;  %v277_v0 = vmov 4   ;;  %v278_v1 = vmov 0   ;;  %v37_v2 = vld [vmem:[#allocation5] sm:$0xff]  ;;  %v279_v3 = vmov 2   ;;  %v40_v9 = vlaneseq }
  0x27   :  { %177 = vset.pattern.permute.xlu0 %v277_v0  ;;  %179 = vset.pattern.permute.xlu1 %v278_v1  ;;  %vm38_vm0 = vcmp.gt.f32.partialorder %v37_v2, 0.5  ;;  %v280_v4 = vmov 3   ;;  %v281_v6 = vmov 1   ;;  %v282_v7 = vmov 5   ;;  %v36_v14 = vld [vmem:[#allocation2] sm:$0x7] }
  0x28   :  { %74 = vperm.xlu0 %177, %v37_v2   ;;  %57 = vperm.xlu1 %179, %v37_v2   ;;  %v109_v5 = vsel %vm38_vm0, 1, %v278_v1  ;;  %v283_v8 = vmov 6   ;;  %v41_v10 = vshrl.u32 %v40_v9, 7  ;;  %s284_s1 = smov [#allocation7]  }
  0x29   :  { %s157_s5 = sshll.u32 %s284_s1, 4  ;;  %s158_s5 = int_to_ptr.vmem [resolvable:$true] %s157_s5 }
  0x2a   :  { %v42_v11 = vsub.s32 0, %v41_v10  ;;  %v46_v12 = vsub.s32 1, %v41_v10  ;;  %v50_v13 = vsub.s32 2, %v41_v10  ;;  %s247_s6 = scalar_lea.vmem %s158_s5, 384  ;;  %p252_p3 = scmp.lt.s32.totalorder %s158_s5, %s158_s5 }
  0x2b   :  { %p248_p2 = scmp.ne.s32.totalorder %s158_s5, %s247_s6  ;;  %p253_p4 = scmp.lt.s32.totalorder %s247_s6, %s247_s6 }
  0x2c   :  { %178 = vset.pattern.permute.xlu0 %v279_v3  ;;  %180 = vset.pattern.permute.xlu1 %v280_v4  ;;  %v43_v16 = vrot.slane %v36_v14, %v42_v11  ;;  %v47_v17 = vrot.slane %v36_v14, %v46_v12  ;;  %v51_v18 = vrot.slane %v36_v14, %v50_v13 }
  0x2d   :  { %81 = vperm.xlu0 %178, %v37_v2   ;;  %100 = vperm.xlu1 %180, %v37_v2   ;;  %p254_p5 = por %p253_p4, %p252_p3 }
  0x2f   :  { %p255_p6 = pnand %p254_p5, %p248_p2 }
  0x31   :  { %181 = vset.pattern.permute.xlu1 %v281_v6  ;;  %182 = vset.pattern.permute.xlu0 %v282_v7 }
  0x32   :  { %67 = vperm.xlu1 %181, %v37_v2   ;;  %111 = vperm.xlu0 %182, %v109_v5  }
  0x36   :  { %183 = vset.pattern.permute.xlu1 %v283_v8  ;;  %184 = vset.pattern.permute.xlu0 %v283_v8 }
  0x37   :  { %142 = vperm.xlu1 %183, %v37_v2  }
  0xa7   :  { %v75_v15 = vpop.permute.xlu0 %74  ;;  %v58_v32 = vpop.permute.xlu1 %57 }
  0xa8   :  { %v77_v19 = vsub.f32 %v43_v16, %v75_v15  ;;  %v78_v20 = vsub.f32 %v47_v17, %v75_v15  ;;  %v79_v21 = vsub.f32 %v51_v18, %v75_v15  ;;  %v60_v34 = vsub.f32 %v43_v16, %v58_v32 }
  0xa9   :  { %v61_v35 = vsub.f32 %v47_v17, %v58_v32  ;;  %v62_v36 = vsub.f32 %v51_v18, %v58_v32 }
  0xaa   :  { %v63_v39 = vmul.f32 %v60_v34, %v60_v34 }
  0xab   :  { %v64_v43 = vmul.f32 %v61_v35, %v61_v35  ;;  %v65_v46 = vmul.f32 %v62_v36, %v62_v36 }
  0xac   :  { %v82_v22 = vpop.permute.xlu0 %81  ;;  %v101_v33 = vpop.permute.xlu1 %100 }
  0xad   :  { %v84_v23 = vmul.f32 %v82_v22, %v77_v19  ;;  %v85_v24 = vmul.f32 %v82_v22, %v78_v20  ;;  %v86_v25 = vmul.f32 %v82_v22, %v79_v21 }
  0xaf   :  { %v87_v26 = vmul.f32 %v84_v23, %v84_v23  ;;  %v88_v27 = vmul.f32 %v85_v24, %v85_v24  ;;  %v89_v28 = vmul.f32 %v86_v25, %v86_v25 }
  0xb1   :  { %v90_v29 = vmax.f32 %v87_v26, 1e-30  ;;  %v91_v30 = vmax.f32 %v88_v27, 1e-30  ;;  %v92_v31 = vmax.f32 %v89_v28, 1e-30  ;;  %v112_v41 = vpop.permute.xlu0 %111  ;;  %v68_v45 = vpop.permute.xlu1 %67 }
  0xb2   :  { %vm113_vm1 = vcmp.eq.s32.totalorder %v112_v41, 1  ;;  %v70_v52 = vmul.f32 %v68_v45, %v63_v39  ;;  %v71_v54 = vmul.f32 %v68_v45, %v64_v43  ;;  %v72_v56 = vmul.f32 %v68_v45, %v65_v46 }
  0xb3   :  { %185 = vlog2.f32 %v90_v29 }
  0xb4   :  { %187 = vlog2.f32 %v91_v30 }
  0xb5   :  { %189 = vlog2.f32 %v92_v31 }
  0xb6   :  { %v143_v13 = vpop.permute.xlu1 %142 }
  0xbd   :  { %v186_v37 = vpop.eup %185 }
  0xbe   :  { %v188_v38 = vpop.eup %187  ;;  %v94_v40 = vmul.f32 0.6931472, %v186_v37 }
  0xbf   :  { %v190_v42 = vpop.eup %189  ;;  %v96_v44 = vmul.f32 0.6931472, %v188_v38 }
  0xc0   :  { %v98_v47 = vmul.f32 0.6931472, %v190_v42  ;;  %v103_v48 = vmul.f32 %v101_v33, %v94_v40 }
  0xc1   :  { %v104_v49 = vmul.f32 %v101_v33, %v96_v44 }
  0xc2   :  { %v105_v50 = vmul.f32 %v101_v33, %v98_v47  ;;  %v106_v51 = vmin.f32 %v103_v48, 85.0 }
  0xc3   :  { %v107_v53 = vmin.f32 %v104_v49, 85.0 }
  0xc4   :  { %v108_v55 = vmin.f32 %v105_v50, 85.0  ;;  %v114_v57 = vsel %vm113_vm1, %v106_v51, %v70_v52 }
  0xc5   :  { %v115_v58 = vsel %vm113_vm1, %v107_v53, %v71_v54  ;;  %v117_v59 = vmul.f32 1.442695, %v114_v57 }
  0xc6   :  { %v116_v60 = vsel %vm113_vm1, %v108_v55, %v72_v56  ;;  %v119_v61 = vmul.f32 1.442695, %v115_v58 }
  0xc7   :  { %191 = vpow2.f32 %v117_v59  ;;  %v121_v62 = vmul.f32 1.442695, %v116_v60 }
  0xc8   :  { %193 = vpow2.f32 %v119_v61 }
  0xc9   :  { %195 = vpow2.f32 %v121_v62 }
  0xd1   :  { %v192_v63 = vpop.eup %191 }
  0xd2   :  { %v194_v0 = vpop.eup %193  ;;  %v123_v1 = vadd.f32 1.0, %v192_v63 }
  0xd3   :  { %v196_v2 = vpop.eup %195  ;;  %v124_v3 = vadd.f32 1.0, %v194_v0 }
  0xd4   :  { %v125_v4 = vadd.f32 1.0, %v196_v2  ;;  %197 = vrcp.f32 %v123_v1 }
  0xd5   :  { %199 = vrcp.f32 %v124_v3 }
  0xd6   :  { %201 = vrcp.f32 %v125_v4 }
  0xde   :  { %v198_v5 = vpop.eup %197 }
  0xdf   :  { %v200_v6 = vpop.eup %199  ;;  %v129_v7 = vmul.f32 %v198_v5, %v123_v1 }
  0xe0   :  { %v202_v8 = vpop.eup %201  ;;  %v130_v9 = vmul.f32 %v200_v6, %v124_v3 }
  0xe1   :  { %v131_v10 = vmul.f32 %v202_v8, %v125_v4  ;;  %v132_v11 = vsub.f32 2.0, %v129_v7 }
  0xe2   :  { %v133_v12 = vsub.f32 2.0, %v130_v9 }
  0xe3   :  { %v134_v14 = vsub.f32 2.0, %v131_v10  ;;  %v135_v15 = vmul.f32 %v198_v5, %v132_v11 }
  0xe4   :  { %v136_v16 = vmul.f32 %v200_v6, %v133_v12 }
  0xe5   :  { %v137_v17 = vmul.f32 %v202_v8, %v134_v14  ;;  %v138_v18 = vsel %vm113_vm1, %v135_v15, %v192_v63 }
  0xe6   :  { %v139_v19 = vsel %vm113_vm1, %v136_v16, %v194_v0  ;;  %v145_v20 = vmul.f32 %v143_v13, %v138_v18 }
  0xe7   :  { %v140_v21 = vsel %vm113_vm1, %v137_v17, %v196_v2  ;;  %v146_v22 = vmul.f32 %v143_v13, %v139_v19 }
  0xe8   :  { %v147_v23 = vmul.f32 %v143_v13, %v140_v21  ;;  %148 = vst [vmem:[#allocation7] sm:$0xff] %v145_v20 }
  0xe9   :  { %149 = vst [vmem:[#allocation7 + $0x8] sm:$0xff] %v146_v22 }
  0xea   :  { %150 = vst [vmem:[#allocation7 + $0x10] sm:$0xff] %v147_v23 }
  0xeb   :  { %258 = shalt.err (!%p255_p6)
}
  0xec   :  { %s259_s9 = scalar_lea.hbm %s344_s2, 384 }
  0xed   :  { %p260_p7 = scmp.ne.s32.totalorder %s344_s2, %s259_s9  ;;  %p263_p8 = scmp.lt.u32.totalorder %s259_s9, %s344_s2 }
  0xef   :  { %p265_p9 = pnand %p263_p8, %p260_p7 }
  0xf1   :  { %268 = shalt.err (!%p265_p9)
}
  0xf2   :  { %160 = dma.vmem_to_hbm [thread:$0]  %s158_s5, 384, %s344_s2, [#allocation4]  }
  0xf3   :  { %273 = dma.done.wait [#allocation4], 384  }
  0xf4   :  { %274 = vsyncadd [#allocation4], 4294966912 }
  0xf5   :  { %164 = vsyncpa [#allocation3], 1 }
  0xf6   :  { %165 = vsyncpa [#allocation6], 1 }
  0xf7   :  { %166 = vsyncpa [#allocation4], 1 }

</bundles_post_ra>
